<compile_context>
chip_gen: v7x
topology: tpu7x:2x2x1
jax: 0.10.0
libtpu: 0.0.40
codegen_flags: <defaults>
</compile_context>

<pallas_src>
import functools

import jax
import jax.numpy as jnp
from jax import lax
from jax.experimental import pallas as pl
from jax.experimental.pallas import tpu as pltpu


# ----------------------------------------------------------------------------
# chip-generation gating
# ----------------------------------------------------------------------------
def _device_kind():
    try:
        return jax.devices()[0].device_kind.lower()
    except Exception:
        return ""


_KIND = _device_kind()
# Integer MXU exists on v4/v5/v6; v7x dropped it (fp8 only) so it keeps exact bf16 codes.
_HAS_INT_MXU = any(tag in _KIND for tag in ("v4", "v5", "v6"))
_DEFAULT_CODE_DTYPE = jnp.int8 if _HAS_INT_MXU else jnp.bfloat16

if _HAS_INT_MXU:                                   # 128 MiB VMEM chips
    _VMEM_LIMIT_BYTES = 96 * 1024 * 1024
elif "v7" in _KIND or "7x" in _KIND:               # 64 MiB VMEM chip: keep pipelining headroom
    _VMEM_LIMIT_BYTES = 48 * 1024 * 1024
else:                                              # unknown chip / CPU interpret: compiler default
    _VMEM_LIMIT_BYTES = None

# Projection M-tile targets (weight re-streaming amortization): ridge ~240 on v5e, big VMEM on v6e.
_PROJ_TM_TARGET = 1024 if "v6" in _KIND else (256 if "v5" in _KIND else 512)


def _compiler_params(dimension_semantics):
    kwargs = dict(dimension_semantics=dimension_semantics)
    if _VMEM_LIMIT_BYTES is not None:
        kwargs["vmem_limit_bytes"] = _VMEM_LIMIT_BYTES
    return pltpu.CompilerParams(**kwargs)


def _pick_tile(dim, target, granule):
    """Largest multiple of `granule` that divides `dim` and is <= target; else the full dim."""
    if dim <= target or dim % granule != 0:
        return dim
    t = (target // granule) * granule
    while t >= granule:
        if dim % t == 0:
            return t
        t -= granule
    return dim


# ----------------------------------------------------------------------------
# per-token activation absmax quantization  ->  integer codes (int8/bf16) + f32 scale
# ----------------------------------------------------------------------------
def _act_quant_kernel(x_ref, codes_ref, scale_ref):
    x = x_ref[...]                                                       # (tm, K) f32
    s = jnp.maximum(jnp.max(jnp.abs(x), axis=-1, keepdims=True), 1e-5) * (1.0 / 127.0)
    codes_ref[...] = jnp.round(x * (1.0 / s)).astype(codes_ref.dtype)    # |codes| <= 127
    scale_ref[...] = s


def act_quant_per_token(x, code_dtype):
    """x: (M, K) f32  ->  (codes (M, K) code_dtype, scale f32 (M, 1))."""
    M, K = x.shape
    tm = _pick_tile(M, 512, 8)
    return pl.pallas_call(
        _act_quant_kernel,
        out_shape=(jax.ShapeDtypeStruct((M, K), code_dtype),
                   jax.ShapeDtypeStruct((M, 1), jnp.float32)),
        grid=(M // tm,),
        in_specs=[pl.BlockSpec((tm, K), lambda i: (i, 0))],
        out_specs=(pl.BlockSpec((tm, K), lambda i: (i, 0)),
                   pl.BlockSpec((tm, 1), lambda i: (i, 0))),
        compiler_params=_compiler_params(("parallel",)),
    )(x)


# ----------------------------------------------------------------------------
# stacked W8A8 projection:  out[p] = (codes @ w_codes[p]) * s_x * s_w[p] + b[p]
# grid = (M//tm, P, K//tk): M leading (megacore balance), K innermost (accumulator).
# projection p == 0 optionally gets the per-token output requant (quantize_bmm_input)
# and the attention `scaling` fold.
# NOTE: the p==0 requant is exact only because N is untiled (the output block spans
#       the full row, so the per-token absmax is the true absmax). Keep N untiled.
# ----------------------------------------------------------------------------
def _w8a8_proj_kernel(xc_ref, wc_ref, xs_ref, ws_ref, b_ref, o_ref, acc_ref, *,
                      quantize_p0_output, p0_out_scale):
    # All program_id / num_programs reads happen at the top level of the kernel body
    # (never inside a pl.when body) so interpret / Mosaic lowering both see them.
    k_idx = pl.program_id(2)
    nk = pl.num_programs(2)
    is_p0 = pl.program_id(1) == 0

    @pl.when(k_idx == 0)
    def _():
        acc_ref[...] = jnp.zeros_like(acc_ref)

    # int8 x int8 -> int32 on v4/v5/v6; bf16 x bf16 -> f32 elsewhere (codes exact either way).
    acc_ref[...] += jnp.dot(xc_ref[...], wc_ref[0],
                            preferred_element_type=acc_ref.dtype)

    @pl.when(k_idx == nk - 1)
    def _():
        y = acc_ref[...].astype(jnp.float32) * xs_ref[...] * ws_ref[0] + b_ref[0]   # (tm, N)
        if quantize_p0_output or p0_out_scale != 1.0:
            yq = y
            if quantize_p0_output:
                so = jnp.maximum(jnp.max(jnp.abs(y), axis=-1, keepdims=True),
                                 1e-5) * (1.0 / 127.0)
                yq = jnp.round(y * (1.0 / so)) * so
            # arithmetic blend on the scalar predicate: p==0 -> requant * scaling, else unchanged
            sel = is_p0.astype(jnp.float32)
            y = sel * (yq * p0_out_scale) + (1.0 - sel) * y
        o_ref[0] = y.astype(o_ref.dtype)


def w8a8_stacked_proj(x_codes, x_scale, w_codes, w_scale, bias, *,
                      quantize_p0_output=False, p0_out_scale=1.0,
                      out_dtype=jnp.float32, tm_target=None, tk_target=512):
    """x_codes: (M, K), x_scale: (M, 1) f32,
       w_codes: (P, K, N), w_scale/bias: (P, 1, N) f32  ->  (P, M, N) out_dtype."""
    M, K = x_codes.shape
    P, _, N = w_codes.shape
    if tm_target is None:
        tm_target = _PROJ_TM_TARGET
    tm = _pick_tile(M, tm_target, 8)
    tk = _pick_tile(K, tk_target, 128)
    acc_dtype = jnp.int32 if x_codes.dtype == jnp.int8 else jnp.float32
    kernel = functools.partial(_w8a8_proj_kernel,
                               quantize_p0_output=quantize_p0_output,
                               p0_out_scale=float(p0_out_scale))
    return pl.pallas_call(
        kernel,
        out_shape=jax.ShapeDtypeStruct((P, M, N), out_dtype),
        grid=(M // tm, P, K // tk),
        in_specs=[
            pl.BlockSpec((tm, tk), lambda i, p, kk: (i, kk)),
            pl.BlockSpec((1, tk, N), lambda i, p, kk: (p, kk, 0)),
            pl.BlockSpec((tm, 1), lambda i, p, kk: (i, 0)),
            pl.BlockSpec((1, 1, N), lambda i, p, kk: (p, 0, 0)),
            pl.BlockSpec((1, 1, N), lambda i, p, kk: (p, 0, 0)),
        ],
        out_specs=pl.BlockSpec((1, tm, N), lambda i, p, kk: (p, i, 0)),
        scratch_shapes=[pltpu.VMEM((tm, N), acc_dtype)],
        compiler_params=_compiler_params(("parallel", "parallel", "arbitrary")),
    )(x_codes, w_codes, x_scale, w_scale, bias)


# ----------------------------------------------------------------------------
# flash-style multi-head attention, lane-dense (B, T, C) layout, bf16 MXU operands.
# grid = (B, T//tq, S//tk) with the KV axis innermost (online softmax).
# Optional additive mask (B, 1, T, S) f32, broadcast over heads via the index_map.
# The finalize step emits the per-token int8/bf16 codes + scale needed by out_proj
# (fused activation quant -> no separate pass over the attention output).
# TODO(synk): for models with head_dim a multiple of 128, a per-head grid axis would avoid the
#             in-kernel head unroll; kept the lane-dense (B,T,C) layout + head loop here.
# ----------------------------------------------------------------------------
def _mha_flash_kernel(*refs, num_heads, head_dim, has_mask):
    if has_mask:
        q_ref, k_ref, v_ref, mask_ref, codes_ref, scale_ref, m_sc, l_sc, acc_sc = refs
    else:
        q_ref, k_ref, v_ref, codes_ref, scale_ref, m_sc, l_sc, acc_sc = refs

    kv = pl.program_id(2)
    nkv = pl.num_programs(2)

    @pl.when(kv == 0)
    def _():
        m_sc[...] = jnp.full_like(m_sc, -jnp.inf)
        l_sc[...] = jnp.zeros_like(l_sc)
        acc_sc[...] = jnp.zeros_like(acc_sc)

    q_all = q_ref[0]                                         # (tq, C) bf16, already * scaling
    k_all = k_ref[0]                                         # (tk, C) bf16
    v_all = v_ref[0]                                         # (tk, C) bf16
    mask = mask_ref[0, 0] if has_mask else None              # (tq, tk) f32

    for h in range(num_heads):
        sl = slice(h * head_dim, (h + 1) * head_dim)
        # bf16 x bf16 -> f32 on the MXU; contract last dims directly (no explicit transpose).
        s = lax.dot_general(q_all[:, sl], k_all[:, sl], (((1,), (1,)), ((), ())),
                            preferred_element_type=jnp.float32)          # (tq, tk)
        if has_mask:
            s = s + mask
        m_prev = m_sc[h]                                                 # (tq, 1)
        m_new = jnp.maximum(m_prev, jnp.max(s, axis=-1, keepdims=True))
        alpha = jnp.exp(m_prev - m_new)
        p = jnp.exp(s - m_new)
        l_sc[h] = alpha * l_sc[h] + jnp.sum(p, axis=-1, keepdims=True)
        acc_sc[h] = alpha * acc_sc[h] + jnp.dot(p.astype(jnp.bfloat16), v_all[:, sl],
                                                preferred_element_type=jnp.float32)
        m_sc[h] = m_new

    @pl.when(kv == nkv - 1)
    def _():
        # assemble the full (tq, C) row once -> single lane-dense store.
        rows = [acc_sc[h] * (1.0 / l_sc[h]) for h in range(num_heads)]
        out = jnp.concatenate(rows, axis=-1)                              # (tq, C) f32
        # fused out_proj per-token activation quant (row spans full C -> exact absmax).
        s_o = jnp.maximum(jnp.max(jnp.abs(out), axis=-1, keepdims=True),
                          1e-5) * (1.0 / 127.0)
        codes_ref[0] = jnp.round(out * (1.0 / s_o)).astype(codes_ref.dtype)
        scale_ref[0] = s_o


def mha_flash(q, k, v, mask, num_heads, *, code_dtype, tq_target=256, tk_target=256):
    """q: (B, T, C) bf16, k/v: (B, S, C) bf16, mask: (B, 1, T, S) f32 additive or None
       -> (codes (B, T, C) code_dtype, scale (B, T, 1) f32) for the out_proj W8A8 matmul."""
    B, T, C = q.shape
    S = k.shape[1]
    head_dim = C // num_heads
    tq = _pick_tile(T, tq_target, 8)
    tk = _pick_tile(S, tk_target, 128)
    has_mask = mask is not None
    kernel = functools.partial(_mha_flash_kernel, num_heads=num_heads,
                               head_dim=head_dim, has_mask=has_mask)
    in_specs = [
        pl.BlockSpec((1, tq, C), lambda b, iq, ik: (b, iq, 0)),
        pl.BlockSpec((1, tk, C), lambda b, iq, ik: (b, ik, 0)),
        pl.BlockSpec((1, tk, C), lambda b, iq, ik: (b, ik, 0)),
    ]
    args = [q, k, v]
    if has_mask:
        in_specs.append(pl.BlockSpec((1, 1, tq, tk), lambda b, iq, ik: (b, 0, iq, ik)))
        args.append(mask)
    return pl.pallas_call(
        kernel,
        out_shape=(jax.ShapeDtypeStruct((B, T, C), code_dtype),
                   jax.ShapeDtypeStruct((B, T, 1), jnp.float32)),
        grid=(B, T // tq, S // tk),
        in_specs=in_specs,
        out_specs=(pl.BlockSpec((1, tq, C), lambda b, iq, ik: (b, iq, 0)),
                   pl.BlockSpec((1, tq, 1), lambda b, iq, ik: (b, iq, 0))),
        scratch_shapes=[
            pltpu.VMEM((num_heads, tq, 1), jnp.float32),         # running max m
            pltpu.VMEM((num_heads, tq, 1), jnp.float32),         # running sum l
            pltpu.VMEM((num_heads, tq, head_dim), jnp.float32),  # running accumulator
        ],
        compiler_params=_compiler_params(("parallel", "parallel", "arbitrary")),
    )(*args)


# ----------------------------------------------------------------------------
# module glue
# ----------------------------------------------------------------------------
def _weight_quant_per_channel(w):
    """SmoothQuant per-output-channel absmax quant: integer codes (N,K) and scale (N,1)."""
    s = jnp.maximum(jnp.max(jnp.abs(w), axis=-1, keepdims=True), 1e-5) * (1.0 / 127.0)
    return jnp.round(w / s), s


class QuantOPTAttentionPallas:
    def __init__(self, embed_dim, num_heads, params, quantize_bmm_input=True, code_dtype=None):
        assert embed_dim % num_heads == 0
        self.embed_dim = embed_dim
        self.num_heads = num_heads
        self.head_dim = embed_dim // num_heads
        self.scaling = self.head_dim ** (-0.5)
        self.quantize_bmm_input = quantize_bmm_input
        self.code_dtype = _DEFAULT_CODE_DTYPE if code_dtype is None else code_dtype

        # Pre-quantize + pre-transpose weights once; codes stored in the chip-appropriate dtype
        # (int8 on v4/v5/v6, exact bf16 integers elsewhere).
        cq, sq = _weight_quant_per_channel(params["q_w"])
        ck, sk = _weight_quant_per_channel(params["k_w"])
        cv, sv = _weight_quant_per_channel(params["v_w"])
        co, so = _weight_quant_per_channel(params["o_w"])
        C = embed_dim
        cd = self.code_dtype
        self.qkv_w_codes = jnp.stack([cq.T, ck.T, cv.T]).astype(cd)                    # (3, K, C)
        self.qkv_w_scale = jnp.stack([sq.reshape(1, C), sk.reshape(1, C), sv.reshape(1, C)])
        self.qkv_bias = jnp.stack([params["q_b"].reshape(1, C),
                                   params["k_b"].reshape(1, C),
                                   params["v_b"].reshape(1, C)]).astype(jnp.float32)   # (3, 1, C)
        self.o_w_codes = co.T.astype(cd)[None]                                         # (1, K, C)
        self.o_w_scale = so.reshape(1, 1, C)
        self.o_bias = params["o_b"].reshape(1, 1, C).astype(jnp.float32)

    def __call__(self, hidden_states, attention_mask=None):
        bsz, tgt_len, C = hidden_states.shape
        src_len = tgt_len
        x2 = hidden_states.reshape(bsz * tgt_len, C)

        # activation quant once, shared by q/k/v projections (matches per-token act_quant of x).
        xc, xs = act_quant_per_token(x2, self.code_dtype)

        # fused stacked QKV projection; q (p==0) gets the per-token output requant required by
        # quantize_bmm_input plus the * scaling fold, and q/k/v are emitted in bf16.
        qkv = w8a8_stacked_proj(xc, xs, self.qkv_w_codes, self.qkv_w_scale, self.qkv_bias,
                                quantize_p0_output=self.quantize_bmm_input,
                                p0_out_scale=self.scaling,
                                out_dtype=jnp.bfloat16)                                 # (3, M, C)
        q = qkv[0].reshape(bsz, tgt_len, C)
        k = qkv[1].reshape(bsz, tgt_len, C)
        v = qkv[2].reshape(bsz, tgt_len, C)

        mask = None
        if attention_mask is not None:
            mask = attention_mask.astype(jnp.float32).reshape(bsz, 1, tgt_len, src_len)

        # flash attention with fused out_proj activation quant (codes + per-token scale out).
        attn_codes, attn_scale = mha_flash(q, k, v, mask, self.num_heads,
                                           code_dtype=self.code_dtype)
        ac = attn_codes.reshape(bsz * tgt_len, C)
        asc = attn_scale.reshape(bsz * tgt_len, 1)

        out = w8a8_stacked_proj(ac, asc, self.o_w_codes, self.o_w_scale, self.o_bias)[0]
        out = out.reshape(bsz, tgt_len, C)

        past_key_value = (
            k.astype(jnp.float32).reshape(bsz, src_len, self.num_heads,
                                          self.head_dim).transpose(0, 2, 1, 3),
            v.astype(jnp.float32).reshape(bsz, src_len, self.num_heads,
                                          self.head_dim).transpose(0, 2, 1, 3),
        )
        # TODO(synk): cross-attention / incremental past_key_value-concat branches and
        # output_attentions / layer_head_mask paths are not implemented (decoder self-attn only).
        return out, None, past_key_value


# ----------------------------------------------------------------------------
# test
# ----------------------------------------------------------------------------
if __name__ == "__main__":
    bsz, tgt_len, embed_dim, num_heads = 2, 8, 32, 4
    head_dim = embed_dim // num_heads

    key = jax.random.PRNGKey(0)
    ks = jax.random.split(key, 10)
    params = {
        "q_w": 0.02 * jax.random.normal(ks[0], (embed_dim, embed_dim), jnp.float32),
        "k_w": 0.02 * jax.random.normal(ks[1], (embed_dim, embed_dim), jnp.float32),
        "v_w": 0.02 * jax.random.normal(ks[2], (embed_dim, embed_dim), jnp.float32),
        "o_w": 0.02 * jax.random.normal(ks[3], (embed_dim, embed_dim), jnp.float32),
        "q_b": 0.01 * jax.random.normal(ks[4], (embed_dim,), jnp.float32),
        "k_b": 0.01 * jax.random.normal(ks[5], (embed_dim,), jnp.float32),
        "v_b": 0.01 * jax.random.normal(ks[6], (embed_dim,), jnp.float32),
        "o_b": 0.01 * jax.random.normal(ks[7], (embed_dim,), jnp.float32),
    }
    hidden_states = jax.random.normal(ks[8], (bsz, tgt_len, embed_dim), jnp.float32)

    # Additive causal mask (bsz, 1, tgt, src), OPT-style.
    causal = jnp.tril(jnp.ones((tgt_len, tgt_len), jnp.float32))
    attention_mask = jnp.where(causal == 1.0, 0.0, -1e9)[None, None, :, :]
    attention_mask = jnp.broadcast_to(attention_mask, (bsz, 1, tgt_len, tgt_len))

    attn = QuantOPTAttentionPallas(embed_dim, num_heads, params, quantize_bmm_input=True)
    attn_output, attn_weights, past_kv = attn(hidden_states, attention_mask)
    jax.block_until_ready(attn_output)
    jax.block_until_ready(past_kv)

    # pure-JAX reference matching the PyTorch module semantics
    def ref_forward(x, mask):
        def fq_w(w):
            s = jnp.maximum(jnp.max(jnp.abs(w), axis=-1, keepdims=True), 1e-5) / 127.0
            return jnp.round(w / s) * s
        def fq_act(t):
            s = jnp.maximum(jnp.max(jnp.abs(t), axis=-1, keepdims=True), 1e-5) / 127.0
            return jnp.round(t / s) * s
        B, T, C = x.shape
        xq = fq_act(x)
        q = xq @ fq_w(params["q_w"]).T + params["q_b"]
        q = fq_act(q) * (head_dim ** -0.5)
        k = xq @ fq_w(params["k_w"]).T + params["k_b"]
        v = xq @ fq_w(params["v_w"]).T + params["v_b"]
        def heads(t):
            return t.reshape(B, T, num_heads, head_dim).transpose(0, 2, 1, 3)
        qh, kh, vh = heads(q), heads(k), heads(v)
        s = jnp.einsum("bhqd,bhkd->bhqk", qh, kh) + mask
        p = jax.nn.softmax(s, axis=-1)
        o = jnp.einsum("bhqk,bhkd->bhqd", p, vh).transpose(0, 2, 1, 3).reshape(B, T, C)
        return fq_act(o) @ fq_w(params["o_w"]).T + params["o_b"]

    ref_out = ref_forward(hidden_states, attention_mask)
    max_err = float(jnp.max(jnp.abs(attn_output - ref_out)))
    assert max_err < 5e-3, f"max abs err {max_err}"
    assert attn_output.shape == (bsz, tgt_len, embed_dim)
    assert past_kv[0].shape == (bsz, num_heads, tgt_len, head_dim)
    print("KERNEL_OK")
</pallas_src>

<mosaic_0001>
module attributes {stable_mosaic.version = 11 : i64} {
  func.func @_act_quant_kernel(%arg0: i32, %arg1: memref<16x32xf32, #tpu.memory_space<vmem>>, %arg2: memref<16x32xbf16, #tpu.memory_space<vmem>>, %arg3: memref<16x1xf32, #tpu.memory_space<vmem>>) attributes {dimension_semantics = [#tpu.dimension_semantics<parallel>], iteration_bounds = array<i64: 1>, scalar_prefetch = 0 : i64, scratch_operands = 0 : i64, tpu.core_type = #tpu.core_type<tc>, window_params = [{transform_indices = @transform_0, window_bounds = array<i64: 16, 32>}, {transform_indices = @transform_1, window_bounds = array<i64: 16, 32>}, {transform_indices = @transform_2, window_bounds = array<i64: 16, 1>}]} {
    %c0 = arith.constant 0 : index
    %c0_0 = arith.constant 0 : index
    %0 = vector.load %arg1[%c0, %c0_0] : memref<16x32xf32, #tpu.memory_space<vmem>>, vector<16x32xf32>
    %1 = math.absf %0 : vector<16x32xf32>
    %cst = arith.constant dense<0xFF800000> : vector<16xf32>
    %2 = vector.multi_reduction <maximumf>, %1, %cst [1] : vector<16x32xf32> to vector<16xf32>
    %3 = vector.shape_cast %2 : vector<16xf32> to vector<16x1xf32>
    %cst_1 = arith.constant 9.99999974E-6 : f32
    %4 = vector.broadcast %cst_1 : f32 to vector<16x1xf32>
    %5 = arith.maximumf %3, %4 : vector<16x1xf32>
    %cst_2 = arith.constant 0.00787401571 : f32
    %6 = vector.broadcast %cst_2 : f32 to vector<16x1xf32>
    %7 = arith.mulf %5, %6 : vector<16x1xf32>
    %cst_3 = arith.constant 1.000000e+00 : f32
    %8 = vector.broadcast %cst_3 : f32 to vector<16x1xf32>
    %9 = arith.divf %8, %7 : vector<16x1xf32>
    %10 = vector.broadcast %9 : vector<16x1xf32> to vector<16x32xf32>
    %11 = arith.mulf %0, %10 : vector<16x32xf32>
    %12 = math.roundeven %11 : vector<16x32xf32>
    %13 = arith.truncf %12 : vector<16x32xf32> to vector<16x32xbf16>
    %c0_4 = arith.constant 0 : index
    %c0_5 = arith.constant 0 : index
    %14 = vector.load %arg2[%c0_4, %c0_5] : memref<16x32xbf16, #tpu.memory_space<vmem>>, vector<16x32xbf16>
    tpu.vector_store %arg2[%c0_4, %c0_5], %13 {strides = array<i32>} : memref<16x32xbf16, #tpu.memory_space<vmem>>, vector<16x32xbf16>,
    %c0_6 = arith.constant 0 : index
    %c0_7 = arith.constant 0 : index
    %15 = vector.load %arg3[%c0_6, %c0_7] : memref<16x1xf32, #tpu.memory_space<vmem>>, vector<16x1xf32>
    tpu.vector_store %arg3[%c0_6, %c0_7], %7 {strides = array<i32>} : memref<16x1xf32, #tpu.memory_space<vmem>>, vector<16x1xf32>,
    return
  }
  func.func @transform_0(%arg0: i32) -> (i32, i32) {
    %c0_i32 = arith.constant 0 : i32
    %c0_i32_0 = arith.constant 0 : i32
    return %arg0, %c0_i32 : i32, i32
  }
  func.func @transform_1(%arg0: i32) -> (i32, i32) {
    %c0_i32 = arith.constant 0 : i32
    %c0_i32_0 = arith.constant 0 : i32
    return %arg0, %c0_i32 : i32, i32
  }
  func.func @transform_2(%arg0: i32) -> (i32, i32) {
    %c0_i32 = arith.constant 0 : i32
    %c0_i32_0 = arith.constant 0 : i32
    return %arg0, %c0_i32 : i32, i32
  }
}

</mosaic_0001>

<bundles_post_ra>
// kernel: tpu_custom_call.1
= control target key start
LH: loop header
LB: loop body
LE: loop exit
PB: predicated region body
PF: predicated region fallthrough
CT: control target
= control target key end

     0   :  { %8 = vsyncpa [#allocation3], 0  ;;  %s198_s0 = inlined_call_operand.hbm [shape: f32[16,32], index: 0, kind: input, shape index: {}]   ;;  %s199_s1 = inlined_call_operand.hbm [shape: bf16[16,32], index: 1, kind: output, shape index: {0}]   ;;  %s200_s2 = inlined_call_operand.vmem [shape: f32[16,1], index: 2, kind: output, shape index: {1}]  }
   0x1   :  { %9 = vsyncpa [#allocation4], 0  ;;  %s147_s9 = smov [#allocation2]   ;;  %s99_s13 = scalar_lea.hbm %s198_s0, 256 }
   0x2   :  { %s15_s10 = sshll.u32 %s147_s9, 4  ;;  %p100_p0 = scmp.ne.s32.totalorder %s198_s0, %s99_s13  ;;  %s16_s10 = int_to_ptr.vmem [resolvable:$true] %s15_s10 }
   0x3   :  { %p103_p1 = scmp.lt.u32.totalorder %s99_s13, %s198_s0 }
   0x5   :  { %p105_p2 = pnand %p103_p1, %p100_p0 }
   0x7   :  { %108 = shalt.err (!%p105_p2)
}
   0x8   :  { %s109_s18 = scalar_lea.vmem %s16_s10, 256  ;;  %p114_p4 = scmp.lt.s32.totalorder %s16_s10, %s16_s10 }
   0x9   :  { %p110_p3 = scmp.ne.s32.totalorder %s16_s10, %s109_s18  ;;  %p115_p5 = scmp.lt.s32.totalorder %s109_s18, %s109_s18 }
   0xb   :  { %p116_p6 = por %p115_p5, %p114_p4 }
   0xd   :  { %p117_p7 = pnand %p116_p6, %p110_p3 }
   0xf   :  { %120 = shalt.err (!%p117_p7)
}
  0x10   :  { %s148_s19 = smov 128   ;;  %s149_s20 = smov 8  }
  0x11   :  { %21 = dma.hbm_to_vmem [thread:$0]  %s198_s0, 256, %s16_s10, [#allocation3], %s148_s19, %s148_s19, %s149_s20  }
  0x12   :  { %143 = dma.done.wait [#allocation3], 256  }
  0x13   :  { %144 = vsyncadd [#allocation3], 4294967040  ;;  %v25_v0 = vld [vmem:[#allocation2] sm:$0xff]  ;;  %vm29_vm0 = vcmask 261120   ;;  %v26_v1 = vld [vmem:[#allocation2 + $0x8] sm:$0xff]  ;;  %vm59_vm1 = vcmask 7168  }
  0x14   :  { %v27_v2 = vand.u32 2147483647, %v25_v0  ;;  %v28_v3 = vand.u32 2147483647, %v26_v1  ;;  %vm56_vm2 = vcmask 257024   ;;  %s150_s26 = smov [#allocation5]  }
  0x15   :  { %s67_s27 = sshll.u32 %s150_s26, 4  ;;  %s68_s27 = int_to_ptr.vmem [resolvable:$true] %s67_s27 }
  0x16   :  { %v30_v4 = vsel %vm29_vm0, %v27_v2, -inf  ;;  %v33_v5 = vsel %vm29_vm0, %v28_v3, -inf  ;;  %s121_s28 = scalar_lea.vmem %s68_s27, 128  ;;  %p126_p9 = scmp.lt.s32.totalorder %s68_s27, %s68_s27 }
  0x17   :  { %31 = vmax.xlane.f32.xlu0 %v30_v4  ;;  %p122_p8 = scmp.ne.s32.totalorder %s68_s27, %s121_s28  ;;  %p127_p10 = scmp.lt.s32.totalorder %s121_s28, %s121_s28 }
  0x19   :  { %p128_p11 = por %p127_p10, %p126_p9 }
  0x1b   :  { %34 = vmax.xlane.f32.xlu0 %v33_v5  ;;  %p129_p12 = pnand %p128_p11, %p122_p8 }
  0xa4   :  { %v32_v6 = vpop.xlane.xlu0 %31 }
  0xa5   :  { %v36_v7 = vmax.f32 %v32_v6, 1e-05 }
  0xa7   :  { %v38_v8 = vmul.f32 0.007874016, %v36_v7 }
  0xa8   :  { %v35_v9 = vpop.xlane.xlu0 %34 }
  0xa9   :  { %95 = vrcp.f32 %v38_v8  ;;  %60 = vst.msk [vmem:[%s200_s2] sm:$0xff] %vm59_vm1, %v38_v8  ;;  %v37_v10 = vmax.f32 %v35_v9, 1e-05 }
  0xab   :  { %v39_v11 = vmul.f32 0.007874016, %v37_v10 }
  0xad   :  { %97 = vrcp.f32 %v39_v11  ;;  %61 = vst.msk [vmem:[%s200_s2 + $0x8] sm:$0xff] %vm59_vm1, %v39_v11 }
  0xb3   :  { %v96_v12 = vpop.eup %95 }
  0xb4   :  { %v44_v13 = vmul.f32 %v96_v12, %v25_v0 }
  0xb6   :  { %v87_v14 = vround.rtne.f32 %v44_v13 }
  0xb7   :  { %v98_v15 = vpop.eup %97 }
  0xb8   :  { %v45_v16 = vmul.f32 %v98_v15, %v26_v1  ;;  %v85_v17 = vpack.c.bf16 %v87_v14, %v87_v14 }
  0xba   :  { %v88_v18 = vround.rtne.f32 %v45_v16  ;;  %57 = vst.msk [vmem:[#allocation5] sm:$0xf] %vm56_vm2, %v85_v17 }
  0xbc   :  { %v86_v19 = vpack.c.bf16 %v88_v18, %v88_v18 }
  0xbe   :  { %58 = vst.msk [vmem:[#allocation5 + $0x4] sm:$0xf] %vm56_vm2, %v86_v19 }
  0xbf   :  { %132 = shalt.err (!%p129_p12)
}
  0xc0   :  { %s133_s30 = scalar_lea.hbm %s199_s1, 128 }
  0xc1   :  { %p134_p13 = scmp.ne.s32.totalorder %s199_s1, %s133_s30  ;;  %p137_p0 = scmp.lt.u32.totalorder %s133_s30, %s199_s1 }
  0xc3   :  { %p139_p1 = pnand %p137_p0, %p134_p13 }
  0xc5   :  { %142 = shalt.err (!%p139_p1)
}
  0xc6   :  { %s151_s7 = smov 64   ;;  %s152_s8 = smov 4  }
  0xc7   :  { %73 = dma.vmem_to_hbm [thread:$0]  %s68_s27, 128, %s199_s1, [#allocation4], %s151_s7, %s151_s7, %s152_s8  }
  0xc8   :  { %145 = dma.done.wait [#allocation4], 128  }
  0xc9   :  { %146 = vsyncadd [#allocation4], 4294967168 }
  0xca   :  { %81 = vsyncpa [#allocation3], 1 }
  0xcb   :  { %82 = vsyncpa [#allocation4], 1 }

</bundles_post_ra>
